<compile_context>
chip_gen: v6e
topology: v6e:2x2x1
jax: 0.10.0
libtpu: 0.0.40
codegen_flags: <defaults>
</compile_context>

<pallas_src>
import functools

import jax
import jax.numpy as jnp
from jax.experimental import pallas as pl
from jax.experimental.pallas import tpu as pltpu


def _round_up(v, m):
    return ((v + m - 1) // m) * m


# ---------------- fused kernel ----------------------------------------------
# out = relu((A @ (x @ W_msg)) + type_bias[node_types]) @ W_out + b_out
def _fused_kernel(a_ref, x_ref, nt_ref, tb_ref, wm_ref, wo_ref, bo_ref,
                  out_ref, acc_ref, *, tk, n_types, x_resident):
    k = pl.program_id(1)

    @pl.when(k == 0)
    def _():
        acc_ref[...] = jnp.zeros_like(acc_ref)

    # xw tile computed on the fly; kernel is HBM-bound on the A stream, so the
    # redundant small matmul is free.
    if x_resident:
        koff = pl.multiple_of(k * tk, tk)
        x_blk = x_ref[pl.ds(koff, tk), :]          # (tk, F) bf16, VMEM-resident
    else:
        x_blk = x_ref[...]                         # streamed (tk, F) tile
    xw = jnp.dot(x_blk, wm_ref[...],
                 preferred_element_type=jnp.float32).astype(jnp.bfloat16)  # (tk, H)

    # (TM, tk) @ (tk, H) bf16 -> f32 accumulate
    acc_ref[...] += jnp.dot(a_ref[...], xw, preferred_element_type=jnp.float32)

    @pl.when(k == pl.num_programs(1) - 1)
    def _():
        # per-node-type bias via short VPU select chain (T is tiny), exact f32
        type_ids = nt_ref[...]                                     # (TM, 1) i32
        bias = jnp.zeros(acc_ref.shape, jnp.float32)
        for t in range(n_types):
            bias = jnp.where(type_ids == t, tb_ref[pl.ds(t, 1), :], bias)
        hidden = jnp.maximum(acc_ref[...] + bias, 0.0)
        logits = jnp.dot(hidden.astype(jnp.bfloat16), wo_ref[...],
                         preferred_element_type=jnp.float32)       # (TM, C_pad)
        out_ref[...] = logits + bo_ref[...]


def het_model_finetune_forward(x, node_types, edge_index, edge_types, params,
                               *, max_tile=512):
    """Forward pass of HetModelFinetune.

    x:          (N, F) float32 node features
    node_types: (N,)   int32 node type ids
    edge_index: (2, E) int32, row 0 = source nodes, row 1 = dest nodes
    edge_types: (E,)   float32 per-edge scalar weights
    """
    n, f = x.shape
    w_msg = params["w_msg"]            # (F, H)
    type_bias = params["type_bias"]    # (T, H)
    w_out = params["w_out"]            # (H, C)
    b_out = params["b_out"]            # (C,)
    h_dim = w_msg.shape[1]
    c = w_out.shape[1]
    n_types = type_bias.shape[0]

    # --- tiling ---------------------------------------------------------------
    n8 = _round_up(n, 8)
    tm = min(max_tile, n8)
    # v7x has 2 TensorCores: make sure the "parallel" row axis has >= 2 tiles
    # whenever the graph is big enough to split usefully.
    if 256 < n8 <= max_tile:
        tm = _round_up((n8 + 1) // 2, 8)
    n_pad = _round_up(n, tm)
    c_pad = _round_up(c, 128)          # lane-dense output stores

    # Collapse the k reduction axis to a single full-width row slab when the
    # double-buffered (tm, n_pad) bf16 A slab stays well inside VMEM on all
    # generations; otherwise fall back to square tiles.
    if 2 * tm * n_pad * 2 <= (16 << 20):
        tk = n_pad
    else:
        tk = tm
    n_k = n_pad // tk

    # Keep x fully VMEM-resident (read from HBM exactly once) when small enough.
    x_bytes = n_pad * f * 2
    x_resident = x_bytes <= (8 << 20)

    # --- glue (plain JAX): dense adjacency built directly in bf16 --------------
    src = edge_index[0]
    dst = edge_index[1]
    adj = jnp.zeros((n_pad, n_pad), jnp.bfloat16).at[dst, src].add(
        edge_types.astype(jnp.bfloat16))
    x_p = jnp.zeros((n_pad, f), jnp.bfloat16).at[:n, :].set(
        x.astype(jnp.bfloat16))
    nt_p = jnp.zeros((n_pad, 1), jnp.int32).at[:n, 0].set(
        node_types.astype(jnp.int32))
    tb = type_bias.astype(jnp.float32)                               # (T, H)
    wm = w_msg.astype(jnp.bfloat16)                                  # (F, H)
    wo = jnp.zeros((h_dim, c_pad), jnp.bfloat16).at[:, :c].set(
        w_out.astype(jnp.bfloat16))
    bo = jnp.zeros((1, c_pad), jnp.float32).at[0, :c].set(
        b_out.astype(jnp.float32))

    # --- VMEM budget: computed from footprint (v7x 64 MiB friendly) ------------
    vmem_bytes = (
        2 * tm * tk * 2                                   # A tiles (bf16, 2-buf)
        + (x_bytes if x_resident else 2 * tk * f * 2)     # x
        + f * h_dim * 2 + h_dim * c_pad * 2               # W_msg, W_out (bf16)
        + n_types * h_dim * 4 + c_pad * 4                 # type_bias, b_out
        + 2 * tm * 128 * 4                                # node types (lane-padded)
        + 2 * tm * c_pad * 4                              # out tiles (f32, 2-buf)
        + tm * h_dim * 4                                  # accumulator scratch
    )
    vmem_limit = int(min(max(2 * vmem_bytes + (2 << 20), 8 << 20), 48 << 20))

    x_spec = (pl.BlockSpec((n_pad, f), lambda i, k: (0, 0)) if x_resident
              else pl.BlockSpec((tk, f), lambda i, k: (k, 0)))

    kernel = functools.partial(_fused_kernel, tk=tk, n_types=n_types,
                               x_resident=x_resident)

    out = pl.pallas_call(
        kernel,
        out_shape=jax.ShapeDtypeStruct((n_pad, c_pad), jnp.float32),
        grid_spec=pltpu.PrefetchScalarGridSpec(
            num_scalar_prefetch=0,
            grid=(n_pad // tm, n_k),
            in_specs=[
                pl.BlockSpec((tm, tk), lambda i, k: (i, k)),            # A tile
                x_spec,                                                 # x
                pl.BlockSpec((tm, 1), lambda i, k: (i, 0)),             # node types
                pl.BlockSpec((n_types, h_dim), lambda i, k: (0, 0)),    # type bias
                pl.BlockSpec((f, h_dim), lambda i, k: (0, 0)),          # W_msg
                pl.BlockSpec((h_dim, c_pad), lambda i, k: (0, 0)),      # W_out
                pl.BlockSpec((1, c_pad), lambda i, k: (0, 0)),          # b_out
            ],
            out_specs=pl.BlockSpec((tm, c_pad), lambda i, k: (i, 0)),
            scratch_shapes=[pltpu.VMEM((tm, h_dim), jnp.float32)],
        ),
        compiler_params=pltpu.CompilerParams(
            dimension_semantics=("parallel", "arbitrary"),
            vmem_limit_bytes=vmem_limit),
    )(adj, x_p, nt_p, tb, wm, wo, bo)

    return out[:n, :c]


def _reference_forward(x, node_types, edge_index, edge_types, params):
    """Pure-JAX f32 reference for correctness check."""
    n = x.shape[0]
    src, dst = edge_index[0], edge_index[1]
    adj = jnp.zeros((n, n), jnp.float32).at[dst, src].add(edge_types)
    hid = jnp.maximum(
        (adj @ x) @ params["w_msg"] + params["type_bias"][node_types], 0.0)
    return hid @ params["w_out"] + params["b_out"]


if __name__ == "__main__":
    key = jax.random.PRNGKey(0)
    k_x, k_wm, k_tb, k_wo, k_bo, k_adj, k_nt = jax.random.split(key, 7)

    N = 16          # nodes
    F = 32          # input feature dim
    H = 32          # gnn.out_dim
    C = 8           # n_classes
    T = 3           # number of node types

    params = {
        "w_msg": jax.random.normal(k_wm, (F, H), jnp.float32) * 0.1,
        "type_bias": jax.random.normal(k_tb, (T, H), jnp.float32) * 0.1,
        "w_out": jax.random.normal(k_wo, (H, C), jnp.float32) * 0.1,
        "b_out": jax.random.normal(k_bo, (C,), jnp.float32) * 0.1,
    }

    x = jax.random.normal(k_x, (N, F), jnp.float32)
    node_types = jax.random.randint(k_nt, (N,), 0, T, jnp.int32)

    adj_mask = (jax.random.uniform(k_adj, (N, N)) > 0.7).astype(jnp.float32)
    src, dst = jnp.nonzero(adj_mask, size=N * N, fill_value=0)
    num_edges = jnp.sum(adj_mask).astype(jnp.int32)
    valid = (jnp.arange(N * N) < num_edges).astype(jnp.float32)  # zero padded edges
    edge_index = jnp.stack([src, dst]).astype(jnp.int32)
    # edge weights come from a (T, T) edge-type table, like train_step does
    edge_type_table = jnp.arange(1, T * T + 1, dtype=jnp.float32).reshape(T, T) / (T * T)
    edge_types = edge_type_table[node_types[src], node_types[dst]] * valid

    out = het_model_finetune_forward(x, node_types, edge_index, edge_types, params)
    out = jax.block_until_ready(out)

    ref = _reference_forward(x, node_types, edge_index, edge_types, params)
    assert out.shape == (N, C)
    # bf16 MXU operands with f32 accumulation -> loosened tolerance vs f32 ref
    assert jnp.allclose(out, ref, atol=5e-2, rtol=5e-2), \
        float(jnp.max(jnp.abs(out - ref)))

    print("KERNEL_OK")
</pallas_src>

<mosaic_0001>
module attributes {stable_mosaic.version = 11 : i64} {
  func.func @_fused_kernel(%arg0: i32, %arg1: i32, %arg2: memref<16x16xbf16, #tpu.memory_space<vmem>>, %arg3: memref<16x32xbf16, #tpu.memory_space<vmem>>, %arg4: memref<16x1xi32, #tpu.memory_space<vmem>>, %arg5: memref<3x32xf32, #tpu.memory_space<vmem>>, %arg6: memref<32x32xbf16, #tpu.memory_space<vmem>>, %arg7: memref<32x128xbf16, #tpu.memory_space<vmem>>, %arg8: memref<1x128xf32, #tpu.memory_space<vmem>>, %arg9: memref<16x128xf32, #tpu.memory_space<vmem>>, %arg10: memref<16x32xf32, #tpu.memory_space<vmem>>) attributes {dimension_semantics = [#tpu.dimension_semantics<parallel>, #tpu.dimension_semantics<arbitrary>], iteration_bounds = array<i64: 1, 1>, scalar_prefetch = 0 : i64, scratch_operands = 1 : i64, tpu.core_type = #tpu.core_type<tc>, window_params = [{transform_indices = @transform_0, window_bounds = array<i64: 16, 16>}, {pipeline_mode = #tpu.pipeline_mode<synchronous>, transform_indices = @transform_1, window_bounds = array<i64: 16, 32>}, {transform_indices = @transform_2, window_bounds = array<i64: 16, 1>}, {pipeline_mode = #tpu.pipeline_mode<synchronous>, transform_indices = @transform_3, window_bounds = array<i64: 3, 32>}, {pipeline_mode = #tpu.pipeline_mode<synchronous>, transform_indices = @transform_4, window_bounds = array<i64: 32, 32>}, {pipeline_mode = #tpu.pipeline_mode<synchronous>, transform_indices = @transform_5, window_bounds = array<i64: 32, 128>}, {pipeline_mode = #tpu.pipeline_mode<synchronous>, transform_indices = @transform_6, window_bounds = array<i64: 1, 128>}, {transform_indices = @transform_7, window_bounds = array<i64: 16, 128>}]} {
    %c0_i32 = arith.constant 0 : i32
    %0 = arith.cmpi eq, %arg1, %c0_i32 : i32
    %1 = arith.extui %0 : i1 to i32
    %c0_i32_0 = arith.constant 0 : i32
    %2 = arith.cmpi ne, %1, %c0_i32_0 : i32
    scf.if %2 {
      %cst_12 = arith.constant 0.000000e+00 : f32
      %18 = vector.broadcast %cst_12 : f32 to vector<16x32xf32>
      %c0_13 = arith.constant 0 : index
      %c0_14 = arith.constant 0 : index
      %19 = vector.load %arg10[%c0_13, %c0_14] : memref<16x32xf32, #tpu.memory_space<vmem>>, vector<16x32xf32>
      tpu.vector_store %arg10[%c0_13, %c0_14], %18 {strides = array<i32>} : memref<16x32xf32, #tpu.memory_space<vmem>>, vector<16x32xf32>,
    } else {
    }
    %c16_i32 = arith.constant 16 : i32
    %3 = arith.muli %arg1, %c16_i32 : i32
    %4 = tpu.assume_multiple %3, 16 : i32
    %5 = arith.index_cast %4 : i32 to index
    %c0 = arith.constant 0 : index
    %6 = vector.load %arg3[%5, %c0] : memref<16x32xbf16, #tpu.memory_space<vmem>>, vector<16x32xbf16>
    %c0_1 = arith.constant 0 : index
    %c0_2 = arith.constant 0 : index
    %7 = vector.load %arg6[%c0_1, %c0_2] : memref<32x32xbf16, #tpu.memory_space<vmem>>, vector<32x32xbf16>
    %cst = arith.constant dense<0.000000e+00> : vector<16x32xf32>
    %8 = tpu.matmul %6, %7, %cst {dimension_numbers = #tpu.dot_dimension_numbers<[1], [0], [0], [1], [0, 0, 1, 1], [], []>} : vector<16x32xbf16>, vector<32x32xbf16>, vector<16x32xf32> -> vector<16x32xf32>
    %9 = arith.truncf %8 : vector<16x32xf32> to vector<16x32xbf16>
    %c0_3 = arith.constant 0 : index
    %c0_4 = arith.constant 0 : index
    %10 = vector.load %arg10[%c0_3, %c0_4] : memref<16x32xf32, #tpu.memory_space<vmem>>, vector<16x32xf32>
    %c0_5 = arith.constant 0 : index
    %c0_6 = arith.constant 0 : index
    %11 = vector.load %arg2[%c0_5, %c0_6] : memref<16x16xbf16, #tpu.memory_space<vmem>>, vector<16x16xbf16>
    %cst_7 = arith.constant dense<0.000000e+00> : vector<16x32xf32>
    %12 = tpu.matmul %11, %9, %cst_7 {dimension_numbers = #tpu.dot_dimension_numbers<[1], [0], [0], [1], [0, 0, 1, 1], [], []>} : vector<16x16xbf16>, vector<16x32xbf16>, vector<16x32xf32> -> vector<16x32xf32>
    %13 = arith.addf %10, %12 : vector<16x32xf32>
    %c0_8 = arith.constant 0 : index
    %c0_9 = arith.constant 0 : index
    %14 = vector.load %arg10[%c0_8, %c0_9] : memref<16x32xf32, #tpu.memory_space<vmem>>, vector<16x32xf32>
    tpu.vector_store %arg10[%c0_8, %c0_9], %13 {strides = array<i32>} : memref<16x32xf32, #tpu.memory_space<vmem>>, vector<16x32xf32>,
    %c0_i32_10 = arith.constant 0 : i32
    %15 = arith.cmpi eq, %arg1, %c0_i32_10 : i32
    %16 = arith.extui %15 : i1 to i32
    %c0_i32_11 = arith.constant 0 : i32
    %17 = arith.cmpi ne, %16, %c0_i32_11 : i32
    scf.if %17 {
      %c0_12 = arith.constant 0 : index
      %c0_13 = arith.constant 0 : index
      %18 = vector.load %arg4[%c0_12, %c0_13] : memref<16x1xi32, #tpu.memory_space<vmem>>, vector<16x1xi32>
      %cst_14 = arith.constant 0.000000e+00 : f32
      %19 = vector.broadcast %cst_14 : f32 to vector<16x32xf32>
      %c0_i32_15 = arith.constant 0 : i32
      %20 = vector.broadcast %c0_i32_15 : i32 to vector<16x1xi32>
      %21 = arith.cmpi eq, %18, %20 : vector<16x1xi32>
      %c0_16 = arith.constant 0 : index
      %c0_17 = arith.constant 0 : index
      %22 = vector.load %arg5[%c0_16, %c0_17] : memref<3x32xf32, #tpu.memory_space<vmem>>, vector<1x32xf32>
      %23 = vector.shape_cast %21 : vector<16x1xi1> to vector<16x1xi1>
      %24 = vector.broadcast %23 : vector<16x1xi1> to vector<16x32xi1>
      %25 = vector.shape_cast %22 : vector<1x32xf32> to vector<1x32xf32>
      %26 = vector.broadcast %25 : vector<1x32xf32> to vector<16x32xf32>
      %27 = arith.select %24, %26, %19 : vector<16x32xi1>, vector<16x32xf32>
      %c1_i32 = arith.constant 1 : i32
      %28 = vector.broadcast %c1_i32 : i32 to vector<16x1xi32>
      %29 = arith.cmpi eq, %18, %28 : vector<16x1xi32>
      %c1 = arith.constant 1 : index
      %c0_18 = arith.constant 0 : index
      %30 = vector.load %arg5[%c1, %c0_18] : memref<3x32xf32, #tpu.memory_space<vmem>>, vector<1x32xf32>
      %31 = vector.shape_cast %29 : vector<16x1xi1> to vector<16x1xi1>
      %32 = vector.broadcast %31 : vector<16x1xi1> to vector<16x32xi1>
      %33 = vector.shape_cast %30 : vector<1x32xf32> to vector<1x32xf32>
      %34 = vector.broadcast %33 : vector<1x32xf32> to vector<16x32xf32>
      %35 = arith.select %32, %34, %27 : vector<16x32xi1>, vector<16x32xf32>
      %c2_i32 = arith.constant 2 : i32
      %36 = vector.broadcast %c2_i32 : i32 to vector<16x1xi32>
      %37 = arith.cmpi eq, %18, %36 : vector<16x1xi32>
      %c2 = arith.constant 2 : index
      %c0_19 = arith.constant 0 : index
      %38 = vector.load %arg5[%c2, %c0_19] : memref<3x32xf32, #tpu.memory_space<vmem>>, vector<1x32xf32>
      %39 = vector.shape_cast %37 : vector<16x1xi1> to vector<16x1xi1>
      %40 = vector.broadcast %39 : vector<16x1xi1> to vector<16x32xi1>
      %41 = vector.shape_cast %38 : vector<1x32xf32> to vector<1x32xf32>
      %42 = vector.broadcast %41 : vector<1x32xf32> to vector<16x32xf32>
      %43 = arith.select %40, %42, %35 : vector<16x32xi1>, vector<16x32xf32>
      %c0_20 = arith.constant 0 : index
      %c0_21 = arith.constant 0 : index
      %44 = vector.load %arg10[%c0_20, %c0_21] : memref<16x32xf32, #tpu.memory_space<vmem>>, vector<16x32xf32>
      %45 = arith.addf %44, %43 : vector<16x32xf32>
      %cst_22 = arith.constant 0.000000e+00 : f32
      %46 = vector.broadcast %cst_22 : f32 to vector<16x32xf32>
      %47 = arith.maximumf %45, %46 : vector<16x32xf32>
      %48 = arith.truncf %47 : vector<16x32xf32> to vector<16x32xbf16>
      %c0_23 = arith.constant 0 : index
      %c0_24 = arith.constant 0 : index
      %49 = vector.load %arg7[%c0_23, %c0_24] : memref<32x128xbf16, #tpu.memory_space<vmem>>, vector<32x128xbf16>
      %cst_25 = arith.constant dense<0.000000e+00> : vector<16x128xf32>
      %50 = tpu.matmul %48, %49, %cst_25 {dimension_numbers = #tpu.dot_dimension_numbers<[1], [0], [0], [1], [0, 0, 1, 1], [], []>} : vector<16x32xbf16>, vector<32x128xbf16>, vector<16x128xf32> -> vector<16x128xf32>
      %c0_26 = arith.constant 0 : index
      %c0_27 = arith.constant 0 : index
      %51 = vector.load %arg8[%c0_26, %c0_27] : memref<1x128xf32, #tpu.memory_space<vmem>>, vector<1x128xf32>
      %52 = vector.broadcast %51 : vector<1x128xf32> to vector<16x128xf32>
      %53 = arith.addf %50, %52 : vector<16x128xf32>
      %c0_28 = arith.constant 0 : index
      %c0_29 = arith.constant 0 : index
      %54 = vector.load %arg9[%c0_28, %c0_29] : memref<16x128xf32, #tpu.memory_space<vmem>>, vector<16x128xf32>
      tpu.vector_store %arg9[%c0_28, %c0_29], %53 {strides = array<i32>} : memref<16x128xf32, #tpu.memory_space<vmem>>, vector<16x128xf32>,
    } else {
    }
    return
  }
  func.func @transform_0(%arg0: i32, %arg1: i32) -> (i32, i32) {
    %c0_i32 = arith.constant 0 : i32
    return %arg0, %arg1 : i32, i32
  }
  func.func @transform_1(%arg0: i32, %arg1: i32) -> (i32, i32) {
    %c0_i32 = arith.constant 0 : i32
    %c0_i32_0 = arith.constant 0 : i32
    %c0_i32_1 = arith.constant 0 : i32
    return %c0_i32, %c0_i32_0 : i32, i32
  }
  func.func @transform_2(%arg0: i32, %arg1: i32) -> (i32, i32) {
    %c0_i32 = arith.constant 0 : i32
    %c0_i32_0 = arith.constant 0 : i32
    return %arg0, %c0_i32 : i32, i32
  }
  func.func @transform_3(%arg0: i32, %arg1: i32) -> (i32, i32) {
    %c0_i32 = arith.constant 0 : i32
    %c0_i32_0 = arith.constant 0 : i32
    %c0_i32_1 = arith.constant 0 : i32
    return %c0_i32, %c0_i32_0 : i32, i32
  }
  func.func @transform_4(%arg0: i32, %arg1: i32) -> (i32, i32) {
    %c0_i32 = arith.constant 0 : i32
    %c0_i32_0 = arith.constant 0 : i32
    %c0_i32_1 = arith.constant 0 : i32
    return %c0_i32, %c0_i32_0 : i32, i32
  }
  func.func @transform_5(%arg0: i32, %arg1: i32) -> (i32, i32) {
    %c0_i32 = arith.constant 0 : i32
    %c0_i32_0 = arith.constant 0 : i32
    %c0_i32_1 = arith.constant 0 : i32
    return %c0_i32, %c0_i32_0 : i32, i32
  }
  func.func @transform_6(%arg0: i32, %arg1: i32) -> (i32, i32) {
    %c0_i32 = arith.constant 0 : i32
    %c0_i32_0 = arith.constant 0 : i32
    %c0_i32_1 = arith.constant 0 : i32
    return %c0_i32, %c0_i32_0 : i32, i32
  }
  func.func @transform_7(%arg0: i32, %arg1: i32) -> (i32, i32) {
    %c0_i32 = arith.constant 0 : i32
    %c0_i32_0 = arith.constant 0 : i32
    return %arg0, %c0_i32 : i32, i32
  }
}

</mosaic_0001>

<bundles_post_ra>
// kernel: tpu_custom_call.1
= control target key start
LH: loop header
LB: loop body
LE: loop exit
PB: predicated region body
PF: predicated region fallthrough
CT: control target
= control target key end

     0   :  { %12 = vsyncpa [#allocation4], 0  ;;  %s602_s0 = inlined_call_operand.vmem [shape: bf16[16,16], index: 0, kind: input, shape index: {}]   ;;  %s603_s1 = inlined_call_operand.hbm [shape: bf16[16,32], index: 1, kind: input, shape index: {}]   ;;  %s604_s2 = inlined_call_operand.vmem [shape: s32[16,1], index: 2, kind: input, shape index: {}]   ;;  %s605_s3 = inlined_call_operand.hbm [shape: f32[3,32], index: 3, kind: input, shape index: {}]   ;;  %s606_s4 = inlined_call_operand.vmem [shape: bf16[32,32], index: 4, kind: input, shape index: {}]   ;;  %s607_s5 = inlined_call_operand.hbm [shape: bf16[32,128], index: 5, kind: input, shape index: {}]   ;;  %s608_s6 = inlined_call_operand.vmem [shape: f32[1,128], index: 6, kind: input, shape index: {}]   ;;  %s609_s7 = inlined_call_operand.hbm [shape: f32[16,128], index: 7, kind: output, shape index: {}]  }
   0x1   :  { %13 = vsyncpa [#allocation7], 0 }
   0x2   :  { %14 = vsyncpa [#allocation5], 0  ;;  %s512_s24 = smov [#allocation6]   ;;  %s513_s26 = smov [#allocation3]  }
   0x3   :  { %s37_s25 = sshll.u32 %s512_s24, 4  ;;  %s22_s27 = sshll.u32 %s513_s26, 4  ;;  %s38_s25 = int_to_ptr.vmem [resolvable:$true] %s37_s25  ;;  %s23_s27 = int_to_ptr.vmem [resolvable:$true] %s22_s27 }
   0x4   :  { %s434_s28 = scalar_lea.vmem %s38_s25, 64  ;;  %p439_p1 = scmp.lt.s32.totalorder %s38_s25, %s38_s25 }
   0x5   :  { %p435_p0 = scmp.ne.s32.totalorder %s38_s25, %s434_s28  ;;  %p440_p2 = scmp.lt.s32.totalorder %s434_s28, %s434_s28 }
   0x7   :  { %p441_p3 = por %p440_p2, %p439_p1 }
   0x9   :  { %p442_p4 = pnand %p441_p3, %p435_p0 }
   0xb   :  { %445 = shalt.err (!%p442_p4)
}
   0xc   :  { %40 = dma.hbm_to_vmem [thread:$0]  %s605_s3, 64, %s38_s25, [#allocation7]  }
   0xd   :  { %s454_s8 = scalar_lea.vmem %s23_s27, 128  ;;  %p459_p6 = scmp.lt.s32.totalorder %s23_s27, %s23_s27 }
   0xe   :  { %p455_p5 = scmp.ne.s32.totalorder %s23_s27, %s454_s8  ;;  %p460_p7 = scmp.lt.s32.totalorder %s454_s8, %s454_s8 }
  0x10   :  { %p461_p8 = por %p460_p7, %p459_p6 }
  0x12   :  { %p462_p9 = pnand %p461_p8, %p455_p5 }
  0x14   :  { %465 = shalt.err (!%p462_p9)
}
  0x15   :  { %s514_s9 = smov 64   ;;  %s515_s10 = smov 4  }
  0x16   :  { %28 = dma.hbm_to_vmem [thread:$0]  %s603_s1, 128, %s23_s27, [#allocation4], %s514_s9, %s514_s9, %s515_s10  }
  0x17   :  { %s516_s13 = smov [#allocation8]  }
  0x18   :  { %s48_s14 = sshll.u32 %s516_s13, 4  ;;  %s49_s14 = int_to_ptr.vmem [resolvable:$true] %s48_s14 }
  0x19   :  { %s474_s15 = scalar_lea.vmem %s49_s14, 256  ;;  %p479_p11 = scmp.lt.s32.totalorder %s49_s14, %s49_s14 }
  0x1a   :  { %p475_p10 = scmp.ne.s32.totalorder %s49_s14, %s474_s15  ;;  %p480_p12 = scmp.lt.s32.totalorder %s474_s15, %s474_s15 }
  0x1c   :  { %p481_p13 = por %p480_p12, %p479_p11 }
  0x1e   :  { %p482_p0 = pnand %p481_p13, %p475_p10 }
  0x20   :  { %485 = shalt.err (!%p482_p0)
}
  0x21   :  { %54 = dma.hbm_to_vmem [thread:$0]  %s607_s5, 256, %s49_s14, [#allocation7], %s514_s9, %s514_s9, %s515_s10  }
  0x22   :  { %506 = dma.done.wait [#allocation4], 128  }
  0x23   :  { %507 = vsyncadd [#allocation4], 4294967168 }
  0x24   :  { %508 = dma.done.wait [#allocation7], 320  }
  0x25   :  { %509 = vsyncadd [#allocation7], 4294966976  ;;  %vm71_vm0 = vcmask 261120   ;;  %v517_v0 = vmov 0.0   ;;  %vm518_vm1 = vmmov 0   ;;  %v420_v1 = vld [vmem:[%s606_s4 + $0x8] sm:$0xff]  }
  0x26   :  { %385 = vmatprep.subr.bf16.mxu0 %v517_v0  ;;  %389 = vmatprep.mubr.msk.bf16.mxu0 %vm518_vm1, %v517_v0  ;;  %72 = vst.msk [vmem:[#allocation2] sm:$0xff] %vm71_vm0, %v517_v0  ;;  %73 = vst.msk [vmem:[#allocation2 + $0x8] sm:$0xff] %vm71_vm0, %v517_v0  ;;  %v421_v2 = vld [vmem:[%s606_s4] sm:$0xff]   ;;  %v422_v3 = vld [vmem:[#allocation3] sm:$0xff]   ;;  %v519_v6 = vmov 0   ;;  %vm157_vm8 = vcmask 130048  }
  0x27   :  { %393 = vmatprep.subr.bf16.mxu1 %v517_v0  ;;  %395 = vmatprep.mubr.msk.bf16.mxu1 %vm518_vm1, %v517_v0  ;;  %v209_v4 = vld [vmem:[%s604_s2] sm:$0xff]  ;;  %v210_v5 = vld [vmem:[%s604_s2 + $0x8] sm:$0xff]  ;;  %v370_v30 = vld [vmem:[#allocation6] ss:$0 sm:$0xff]  ;;  %s520_s24 = smov [#allocation9]  }
  0x28   :  { %386 = vmatpush3.bf16.msra.mxu0 %v420_v1  ;;  %419 = vset.pattern.permute.xlu1 %v519_v6  ;;  %vm230_vm2 = vcmp.eq.s32.totalorder %v209_v4, 1  ;;  %vm211_vm3 = vcmp.eq.s32.totalorder %v209_v4, 0  ;;  %vm231_vm4 = vcmp.eq.s32.totalorder %v210_v5, 1  ;;  %vm212_vm5 = vcmp.eq.s32.totalorder %v210_v5, 0  ;;  %v423_v18 = vld [vmem:[%s602_s0] sm:$0xff]   ;;  %s349_s25 = sshll.u32 %s520_s24, 4  ;;  %s350_s25 = int_to_ptr.vmem [resolvable:$true] %s349_s25 }
  0x29   :  { %387 = vmatprep.subr.bf16.mxu0 %v517_v0  ;;  %418 = vset.pattern.permute.xlu0 %v519_v6  ;;  %v233_v7 = vsel %vm230_vm2, 1, %v519_v6  ;;  %v214_v8 = vsel %vm211_vm3, 1, %v519_v6  ;;  %v234_v9 = vsel %vm231_vm4, 1, %v519_v6  ;;  %v215_v10 = vsel %vm212_vm5, 1, %v519_v6  ;;  %v424_v19 = vld [vmem:[#allocation8 + $0x8] sm:$0xff]   ;;  %v425_v20 = vld [vmem:[#allocation8] sm:$0xff]   ;;  %p491_p2 = scmp.lt.s32.totalorder %s350_s25, %s350_s25 }
  0x2a   :  { %236 = vperm.xlu1 %419, %v233_v7   ;;  %217 = vperm.xlu0 %418, %v214_v8   ;;  %vm250_vm6 = vcmp.eq.s32.totalorder %v210_v5, 2  ;;  %vm249_vm7 = vcmp.eq.s32.totalorder %v209_v4, 2  ;;  %v371_v33 = vld [vmem:[#allocation6 + $0x1] ss:$0 sm:$0xff]  ;;  %v372_v40 = vld [vmem:[#allocation6 + $0x2] ss:$0 sm:$0xff] }
  0x2b   :  { %v253_v11 = vsel %vm250_vm6, 1, %v519_v6  ;;  %v252_v12 = vsel %vm249_vm7, 1, %v519_v6  ;;  %v373_v51 = vld [vmem:[%s608_s6] ss:$0 sm:$0xff]  ;;  %s486_s26 = scalar_lea.vmem %s350_s25, 256 }
  0x2c   :  { %388 = vmatpush3.bf16.msra.mxu0 %v421_v2  ;;  %p487_p1 = scmp.ne.s32.totalorder %s350_s25, %s486_s26  ;;  %p492_p3 = scmp.lt.s32.totalorder %s486_s26, %s486_s26 }
  0x2d   :  { %v148_v23 = vld [vmem:[#allocation2] sm:$0xff]  ;;  %v149_v29 = vld [vmem:[#allocation2 + $0x8] sm:$0xff] }
  0x2e   :  { %239 = vperm.xlu1 %419, %v234_v9   ;;  %220 = vperm.xlu0 %418, %v215_v10   ;;  %p493_p4 = por %p492_p3, %p491_p2 }
  0x2f   :  { %390 = vmatmul.mubr.msk.bf16.vlgmr.msra.gmra.mxu0 %vm71_vm0, %v422_v3 }
  0x30   :  { %p494_p5 = pnand %p493_p4, %p487_p1 }
  0x32   :  { %258 = vperm.xlu1 %419, %v253_v11   ;;  %255 = vperm.xlu0 %418, %v252_v12  }
  0xa5   :  { %v218_v21 = vpop.permute.xlu0 %217  ;;  %v237_v22 = vpop.permute.xlu1 %236 }
  0xa6   :  { %vm222_vm9 = vcmp.eq.s32.totalorder %v218_v21, 1  ;;  %vm241_vm11 = vcmp.eq.s32.totalorder %v237_v22, 1 }
  0xa7   :  { %v228_v34 = vsel %vm222_vm9, %v370_v30, 0.0 }
  0xa8   :  { %v247_v39 = vsel %vm241_vm11, %v371_v33, %v228_v34 }
  0xa9   :  { %v221_v24 = vpop.permute.xlu0 %220  ;;  %v240_v27 = vpop.permute.xlu1 %239 }
  0xaa   :  { %vm223_vm10 = vcmp.eq.s32.totalorder %v221_v24, 1  ;;  %vm242_vm12 = vcmp.eq.s32.totalorder %v240_v27, 1 }
  0xab   :  { %v229_v37 = vsel %vm223_vm10, %v370_v30, 0.0 }
  0xac   :  { %v248_v42 = vsel %vm242_vm12, %v371_v33, %v229_v37 }
  0xad   :  { %v256_v35 = vpop.permute.xlu0 %255  ;;  %v259_v38 = vpop.permute.xlu1 %258 }
  0xae   :  { %vm260_vm13 = vcmp.eq.s32.totalorder %v256_v35, 1  ;;  %vm261_vm14 = vcmp.eq.s32.totalorder %v259_v38, 1 }
  0xaf   :  { %v266_v43 = vsel %vm260_vm13, %v372_v40, %v247_v39  ;;  %v267_v45 = vsel %vm261_vm14, %v372_v40, %v248_v42 }
  0xef   :  { %v140_v13 = vpop.f32.mrf.mxu0 }
  0xf1   :  { %v391_v14 = vpop.f32.mrf.mxu0 }
  0xf3   :  { %v143_v15 = vpop.f32.mrf.mxu0 }
  0xf4   :  { %v147_v16 = vpack.c.bf16 %v143_v15, %v140_v13 }
  0xf5   :  { %v392_v17 = vpop.f32.mrf.mxu0 }
  0xf6   :  { %394 = vmatpush3.bf16.msra.mxu1 %v147_v16 }
  0xf7   :  { %399 = vmatprep.subr.bf16.mxu1 %v517_v0 }
  0xf9   :  { %396 = vmatmul.mubr.msk.bf16.vlgmr.msra.gmra.mxu1 %vm157_vm8, %v423_v18 }
  0xfa   :  { %403 = vmatprep.mubr.msk.bf16.mxu1 %vm518_vm1, %v517_v0  ;;  %400 = vmatpush3.bf16.msra.mxu1 %v424_v19 }
  0xfb   :  { %401 = vmatprep.subr.bf16.mxu1 %v517_v0 }
  0xfe   :  { %402 = vmatpush3.bf16.msra.mxu1 %v425_v20 }
 0x1b9   :  { %v195_v25 = vpop.f32.mrf.mxu1 }
 0x1ba   :  { %v202_v26 = vadd.f32 %v195_v25, %v148_v23 }
 0x1bb   :  { %v397_v28 = vpop.f32.mrf.mxu1 }
 0x1bc   :  { %204 = vst.msk [vmem:[#allocation2] sm:$0xff] %vm71_vm0, %v202_v26 }
 0x1bd   :  { %v198_v31 = vpop.f32.mrf.mxu1 }
 0x1be   :  { %v203_v32 = vadd.f32 %v198_v31, %v149_v29 }
 0x1bf   :  { %v398_v36 = vpop.f32.mrf.mxu1 }
 0x1c0   :  { %205 = vst.msk [vmem:[#allocation2 + $0x8] sm:$0xff] %vm71_vm0, %v203_v32 }
 0x1c3   :  { %v268_v41 = vld [vmem:[#allocation2] sm:$0xff] }
 0x1c4   :  { %v270_v44 = vadd.f32 %v268_v41, %v266_v43 }
 0x1c6   :  { %v272_v48 = vmax.f32 %v270_v44, 0.0 }
 0x1c7   :  { %v269_v46 = vld [vmem:[#allocation2 + $0x8] sm:$0xff] }
 0x1c8   :  { %v271_v47 = vadd.f32 %v269_v46, %v267_v45 }
 0x1ca   :  { %v273_v49 = vmax.f32 %v271_v47, 0.0 }
 0x1cc   :  { %v274_v50 = vpack.c.bf16 %v273_v49, %v272_v48 }
 0x1ce   :  { %404 = vmatmul.mubr.msk.bf16.vlgmr.msra.gmra.mxu1 %vm71_vm0, %v274_v50 }
 0x28e   :  { %v335_v52 = vpop.f32.mrf.mxu1 }
 0x28f   :  { %v336_v53 = vadd.f32 %v373_v51, %v335_v52 }
 0x290   :  { %v405_v54 = vpop.f32.mrf.mxu1 }
 0x291   :  { %342 = vst [vmem:[#allocation9] sm:$0xff] %v336_v53 }
 0x292   :  { %v338_v55 = vpop.f32.mrf.mxu1 }
 0x293   :  { %v339_v56 = vadd.f32 %v373_v51, %v338_v55 }
 0x294   :  { %v406_v57 = vpop.f32.mrf.mxu1 }
 0x295   :  { %343 = vst [vmem:[#allocation9 + $0x8] sm:$0xff] %v339_v56 }
 0x296   :  { %497 = shalt.err (!%p494_p5)
}
 0x297   :  { %s521_s27 = smov 128   ;;  %s522_s6 = smov 8  }
 0x298   :  { %355 = dma.vmem_to_hbm [thread:$0]  %s350_s25, 256, %s609_s7, [#allocation5], %s521_s27, %s521_s27, %s522_s6  }
 0x299   :  { %510 = dma.done.wait [#allocation5], 256  }
 0x29a   :  { %511 = vsyncadd [#allocation5], 4294967040 }
 0x29b   :  { %359 = vsyncpa [#allocation4], 1 }
 0x29c   :  { %360 = vsyncpa [#allocation7], 1 }
 0x29d   :  { %361 = vsyncpa [#allocation5], 1 }

</bundles_post_ra>
